<compile_context>
chip_gen: v7x
topology: tpu7x:2x2x1
jax: 0.10.0
libtpu: 0.0.40
codegen_flags: <defaults>
</compile_context>

<pallas_src>
import functools

import jax
import jax.numpy as jnp
from jax.experimental import pallas as pl
from jax.experimental.pallas import tpu as pltpu

_VMEM = pl.BlockSpec(memory_space=pltpu.MemorySpace.VMEM)
_BN_EPS = 1e-5


# ----------------------------- in-kernel helpers -----------------------------

def _fold_taps(x2, K, B, L):
    """(B*L, C) f32 -> (B*L, K*C): lane-concat of the K tap-shifted views.

    Row r = b*L + l of tap k holds x[b, l + k - (K-1)//2, :] (zero outside
    [0, L)).  Shifts use pltpu.roll on the sublane axis of the flat (B*L, C)
    view; rows that wrap across batch boundaries are exactly the halo rows, so a
    single in-range mask handles both zero padding and batch isolation.
    """
    C = x2.shape[-1]
    if K == 1:
        return x2
    pad = (K - 1) // 2
    lidx = jax.lax.broadcasted_iota(jnp.int32, (B, L, C), 1).reshape(B * L, C)
    taps = []
    for k in range(K):
        s = k - pad
        if s == 0:
            taps.append(x2)
            continue
        rolled = pltpu.roll(x2, shift=(-s) % (B * L), axis=0)
        valid = jnp.logical_and(lidx >= -s, lidx < L - s)
        taps.append(jnp.where(valid, rolled, 0.0))
    return jnp.concatenate(taps, axis=-1)


def _bn_relu(acc, gamma, beta):
    """Training-mode BatchNorm1d (stats over all rows, biased var) + ReLU (f32)."""
    mean = jnp.mean(acc, axis=0, keepdims=True)
    cen = acc - mean
    var = jnp.mean(cen * cen, axis=0, keepdims=True)
    y = cen * jax.lax.rsqrt(var + _BN_EPS) * gamma + beta
    return jnp.maximum(y, 0.0)


def _conv_bn_relu(x2, w, gamma, beta, K, B, L):
    """Conv1d(K, stride 1, 'same' pad) + BN + ReLU.

    x2: (B*L, Cin) f32; w: (K*Cin, Cout) bf16 tap-major fold.  Single MXU matmul
    over the folded contraction; conv bias omitted (cancels under batch-stat BN).
    """
    xs = _fold_taps(x2, K, B, L).astype(w.dtype)
    acc = jnp.dot(xs, w, preferred_element_type=jnp.float32)
    return _bn_relu(acc, gamma, beta)


# --------------------------------- kernels -----------------------------------

def _enc_stage_kernel(x_ref, w1_ref, g1_ref, b1_ref, w2_ref, g2_ref, b2_ref,
                      o_ref, *, B, L, k1, k2, pool_input):
    """Fused [optional MaxPool1d(2,2)] + DoubleConv (conv+BN+ReLU twice).

    If pool_input, x_ref is the previous stage output in "pair form"
    (B*L, 2*Cin): lanes [:Cin] are the even time steps, lanes [Cin:] the odd
    ones, so the pool is a lane-slice max (no strided HBM gather, no extra
    kernel, the pooled tensor never touches HBM).
    """
    if pool_input:
        xv = x_ref[...]
        cin = xv.shape[-1] // 2
        x = jnp.maximum(xv[:, :cin], xv[:, cin:]).astype(jnp.float32)
    else:
        x = x_ref[...].astype(jnp.float32)
    h = _conv_bn_relu(x, w1_ref[...], g1_ref[...], b1_ref[...], k1, B, L)
    h = _conv_bn_relu(h, w2_ref[...], g2_ref[...], b2_ref[...], k2, B, L)
    o_ref[...] = h.astype(o_ref.dtype)


def _dec_stage_kernel(up_ref, skip_ref, w1u_ref, w1s_ref, g1_ref, b1_ref,
                      w2_ref, g2_ref, b2_ref, o_ref, *, B, L, k1, k2):
    """Fused decoder DoubleConv.  The channel concat [up, skip] of the first conv
    is realized as two folded matmuls (up-part + skip-part) summed into one
    accumulator, so the concatenated tensor is never materialized."""
    up = up_ref[...].astype(jnp.float32)
    sk = skip_ref[...].astype(jnp.float32)
    xs_u = _fold_taps(up, k1, B, L).astype(w1u_ref.dtype)
    xs_s = _fold_taps(sk, k1, B, L).astype(w1s_ref.dtype)
    acc = jnp.dot(xs_u, w1u_ref[...], preferred_element_type=jnp.float32)
    acc = acc + jnp.dot(xs_s, w1s_ref[...], preferred_element_type=jnp.float32)
    h = _bn_relu(acc, g1_ref[...], b1_ref[...])
    h = _conv_bn_relu(h, w2_ref[...], g2_ref[...], b2_ref[...], k2, B, L)
    o_ref[...] = h.astype(o_ref.dtype)


def _head_kernel(x_ref, wh_ref, bh_ref, wl_ref, bl_ref, o_ref):
    """Fused 1x1 head conv (+bias) + ReLU + Linear; output lane-padded to 128."""
    h = jnp.dot(x_ref[...], wh_ref[...], preferred_element_type=jnp.float32)
    h = jnp.maximum(h + bh_ref[...], 0.0)
    y = jnp.dot(h.astype(wl_ref.dtype), wl_ref[...],
                preferred_element_type=jnp.float32) + bl_ref[...]
    o_ref[...] = y


# ------------------------------ kernel wrappers ------------------------------

def double_conv_stage(x_flat, blk, *, B, L, pool_input):
    p1, p2 = blk
    cout = p2["w"].shape[-1]
    kernel = functools.partial(_enc_stage_kernel, B=B, L=L,
                               k1=p1["k"], k2=p2["k"], pool_input=pool_input)
    return pl.pallas_call(
        kernel,
        out_shape=jax.ShapeDtypeStruct((B * L, cout), jnp.bfloat16),
        in_specs=[_VMEM] * 7,
        out_specs=_VMEM,
    )(x_flat, p1["w"], p1["g"], p1["bt"], p2["w"], p2["g"], p2["bt"])


def decoder_stage(up_flat, skip_flat, blk, *, B, L):
    p1, p2 = blk
    cout = p2["w"].shape[-1]
    kernel = functools.partial(_dec_stage_kernel, B=B, L=L,
                               k1=p1["k"], k2=p2["k"])
    return pl.pallas_call(
        kernel,
        out_shape=jax.ShapeDtypeStruct((B * L, cout), jnp.bfloat16),
        in_specs=[_VMEM] * 9,
        out_specs=_VMEM,
    )(up_flat, skip_flat, p1["wu"], p1["ws"], p1["g"], p1["bt"],
      p2["w"], p2["g"], p2["bt"])


def head(x_flat, wh, bh, wl, bl):
    BL, C = x_flat.shape
    NP = wl.shape[-1]                    # lane-padded number of classes (128)
    TM = min(BL, 256)                    # row tile; >=256 rows feed the MXU well
    return pl.pallas_call(
        _head_kernel,
        out_shape=jax.ShapeDtypeStruct((BL, NP), jnp.float32),
        grid=(pl.cdiv(BL, TM),),
        in_specs=[pl.BlockSpec((TM, C), lambda i: (i, 0)),
                  pl.BlockSpec((C, C), lambda i: (0, 0)),
                  pl.BlockSpec((1, C), lambda i: (0, 0)),
                  pl.BlockSpec((C, NP), lambda i: (0, 0)),
                  pl.BlockSpec((1, NP), lambda i: (0, 0))],
        out_specs=pl.BlockSpec((TM, NP), lambda i: (i, 0)),
        compiler_params=pltpu.CompilerParams(dimension_semantics=("parallel",)),
    )(x_flat, wh, bh, wl, bl)


# ------------------------------ parameters -----------------------------------

def init_params(key, cont_feats=2, num_classes=2, cat_feats=2, cat_unique=24,
                cat_dim=4, channels=(64, 128, 256), ks=3):
    in_ch = cont_feats + cat_dim * cat_feats            # 2 + 4*2 = 10
    chs = [in_ch] + list(channels)                      # [10, 64, 128, 256]
    keys = iter(jax.random.split(key, 64))

    def conv_p(k, cin, cout, K, fan_in=None):
        fan_in = fan_in if fan_in is not None else cin * K
        bound = 1.0 / (float(fan_in) ** 0.5)
        w = jax.random.uniform(k, (K, cin, cout), jnp.float32, -bound, bound)
        return dict(w=w.reshape(K * cin, cout).astype(jnp.bfloat16),
                    g=jnp.ones((1, cout), jnp.float32),     # BN gamma
                    bt=jnp.zeros((1, cout), jnp.float32),    # BN beta
                    k=K)

    emb = [jax.random.normal(next(keys), (cat_unique, cat_dim), jnp.float32)
           for _ in range(cat_feats)]

    encoder = [[conv_p(next(keys), chs[i], chs[i + 1], ks),
                conv_p(next(keys), chs[i + 1], chs[i + 1], ks)]
               for i in range(len(chs) - 2)]

    bottleneck = [conv_p(next(keys), chs[-2], chs[-1], 1),
                  conv_p(next(keys), chs[-1], chs[-1], 1)]

    decoder = []
    for i in range(len(chs) - 2):
        cu, cs, cout = chs[-i - 1], chs[-i - 2], chs[-i - 2]
        bound = 1.0 / (float((cu + cs) * ks) ** 0.5)
        p1 = dict(
            wu=jax.random.uniform(next(keys), (ks, cu, cout), jnp.float32,
                                  -bound, bound).reshape(ks * cu, cout)
               .astype(jnp.bfloat16),
            ws=jax.random.uniform(next(keys), (ks, cs, cout), jnp.float32,
                                  -bound, bound).reshape(ks * cs, cout)
               .astype(jnp.bfloat16),
            g=jnp.ones((1, cout), jnp.float32),
            bt=jnp.zeros((1, cout), jnp.float32),
            k=ks)
        p2 = conv_p(next(keys), cout, cout, ks)
        decoder.append([p1, p2])

    c1 = chs[1]
    bound = 1.0 / (float(c1) ** 0.5)
    head_w = jax.random.uniform(next(keys), (c1, c1), jnp.float32,
                                -bound, bound).astype(jnp.bfloat16)
    head_b = jax.random.uniform(next(keys), (1, c1), jnp.float32, -bound, bound)
    lin_w = jax.random.uniform(next(keys), (c1, num_classes), jnp.float32,
                               -bound, bound)
    lin_b = jax.random.uniform(next(keys), (1, num_classes), jnp.float32,
                               -bound, bound)
    npad = max(128, ((num_classes + 127) // 128) * 128)   # lane-dense output store
    lin_w_p = jnp.zeros((c1, npad), jnp.float32).at[:, :num_classes].set(lin_w)
    lin_b_p = jnp.zeros((1, npad), jnp.float32).at[:, :num_classes].set(lin_b)

    return dict(emb=emb, encoder=encoder, bottleneck=bottleneck, decoder=decoder,
                head_w=head_w, head_b=head_b,
                lin_w=lin_w_p.astype(jnp.bfloat16), lin_b=lin_b_p,
                num_classes=num_classes)


# --------------------------------- forward -----------------------------------

def unet1d_forward(params, x, cat_feats=2):
    """x: (B, L, cont_feats + cat_feats); last `cat_feats` columns hold int ids."""
    B, L, _ = x.shape
    # categorical embeddings (glue gather), same concat order as the PyTorch model
    parts = [x[..., :-cat_feats]]
    for i in range(cat_feats):
        ids = x[..., -(i + 1)].astype(jnp.int32)
        parts.append(jnp.take(params["emb"][i], ids, axis=0))
    h = jnp.concatenate(parts, axis=-1).astype(jnp.bfloat16).reshape(B * L, -1)

    # encoder (stage >= 1 consumes the previous skip in pair form -> fused pool)
    enc_feats = []
    cur_len = L
    for si, blk in enumerate(params["encoder"]):
        if si == 0:
            x_in, pool = h, False
        else:
            prev, prev_len = enc_feats[-1]
            cur_len = prev_len // 2
            x_in = prev.reshape(B * cur_len, -1)     # (rows/2, 2*C), free reshape
            pool = True
        skip = double_conv_stage(x_in, blk, B=B, L=cur_len, pool_input=pool)
        enc_feats.append((skip, cur_len))

    # bottleneck (fused pool + 1x1 double conv)
    prev, prev_len = enc_feats[-1]
    cur_len = prev_len // 2
    h = double_conv_stage(prev.reshape(B * cur_len, -1), params["bottleneck"],
                          B=B, L=cur_len, pool_input=True)
    # TODO(synk): use_attention=False in defaults; MultiheadAttention branch not implemented.

    # decoder (upsample in glue; concat fused via split weights inside the kernel)
    for idx, blk in enumerate(params["decoder"]):
        skip, skip_len = enc_feats[-1 - idx]
        up = jnp.repeat(h, 2, axis=0)                # nearest 2x upsample (glue)
        h = decoder_stage(up, skip, blk, B=B, L=skip_len)

    # head: 1x1 conv + bias + ReLU + Linear (lane-padded output), slice in glue
    y = head(h, params["head_w"], params["head_b"],
             params["lin_w"], params["lin_b"])        # (B*L, 128) f32
    return y.reshape(B, L, -1)[..., :params["num_classes"]]


# ----------------------------------- main -------------------------------------

if __name__ == "__main__":
    key = jax.random.PRNGKey(0)
    B, L = 2, 16
    cont_feats, cat_feats, cat_unique, num_classes = 2, 2, 24, 2

    k_x, k_cat, k_p = jax.random.split(key, 3)
    x_cont = jax.random.normal(k_x, (B, L, cont_feats), jnp.float32)
    x_cat = jax.random.randint(k_cat, (B, L, cat_feats), 0,
                               cat_unique).astype(jnp.float32)
    x = jnp.concatenate([x_cont, x_cat], axis=-1)     # (B, L, 4)

    params = init_params(k_p, cont_feats=cont_feats, num_classes=num_classes,
                         cat_feats=cat_feats, cat_unique=cat_unique)

    y = unet1d_forward(params, x, cat_feats=cat_feats)
    y = jax.block_until_ready(y)
    assert y.shape == (B, L, num_classes), y.shape
    assert bool(jnp.all(jnp.isfinite(y)))
    print("KERNEL_OK")
</pallas_src>

<mosaic_0001>
module attributes {stable_mosaic.version = 11 : i64} {
  func.func @_enc_stage_kernel(%arg0: memref<32x10xbf16, #tpu.memory_space<vmem>>, %arg1: memref<30x64xbf16, #tpu.memory_space<vmem>>, %arg2: memref<1x64xf32, #tpu.memory_space<vmem>>, %arg3: memref<1x64xf32, #tpu.memory_space<vmem>>, %arg4: memref<192x64xbf16, #tpu.memory_space<vmem>>, %arg5: memref<1x64xf32, #tpu.memory_space<vmem>>, %arg6: memref<1x64xf32, #tpu.memory_space<vmem>>, %arg7: memref<32x64xbf16, #tpu.memory_space<vmem>>) attributes {dimension_semantics = [], scalar_prefetch = 0 : i64, scratch_operands = 0 : i64, tpu.core_type = #tpu.core_type<tc>} {
    %c0 = arith.constant 0 : index
    %c0_0 = arith.constant 0 : index
    %0 = vector.load %arg0[%c0, %c0_0] : memref<32x10xbf16, #tpu.memory_space<vmem>>, vector<32x10xbf16>
    %1 = arith.extf %0 : vector<32x10xbf16> to vector<32x10xf32>
    %c0_1 = arith.constant 0 : index
    %c0_2 = arith.constant 0 : index
    %2 = vector.load %arg1[%c0_1, %c0_2] : memref<30x64xbf16, #tpu.memory_space<vmem>>, vector<30x64xbf16>
    %c0_3 = arith.constant 0 : index
    %c0_4 = arith.constant 0 : index
    %3 = vector.load %arg2[%c0_3, %c0_4] : memref<1x64xf32, #tpu.memory_space<vmem>>, vector<1x64xf32>
    %c0_5 = arith.constant 0 : index
    %c0_6 = arith.constant 0 : index
    %4 = vector.load %arg3[%c0_5, %c0_6] : memref<1x64xf32, #tpu.memory_space<vmem>>, vector<1x64xf32>
    %5 = tpu.iota {dimensions = array<i32: 1>} : vector<2x16x10xi32>
    %6 = vector.shape_cast %5 : vector<2x16x10xi32> to vector<32x10xi32>
    %c1_i32 = arith.constant 1 : i32
    %7 = tpu.dynamic_rotate %1 by %c1_i32 dim 0 : vector<32x10xf32>, i32 -> vector<32x10xf32>
    %c1_i32_7 = arith.constant 1 : i32
    %8 = vector.broadcast %c1_i32_7 : i32 to vector<32x10xi32>
    %9 = arith.cmpi sge, %6, %8 : vector<32x10xi32>
    %c17_i32 = arith.constant 17 : i32
    %10 = vector.broadcast %c17_i32 : i32 to vector<32x10xi32>
    %11 = arith.cmpi slt, %6, %10 : vector<32x10xi32>
    %12 = arith.andi %9, %11 : vector<32x10xi1>
    %cst = arith.constant 0.000000e+00 : f32
    %13 = vector.broadcast %cst : f32 to vector<32x10xf32>
    %14 = arith.select %12, %7, %13 : vector<32x10xi1>, vector<32x10xf32>
    %c31_i32 = arith.constant 31 : i32
    %15 = tpu.dynamic_rotate %1 by %c31_i32 dim 0 : vector<32x10xf32>, i32 -> vector<32x10xf32>
    %c-1_i32 = arith.constant -1 : i32
    %16 = vector.broadcast %c-1_i32 : i32 to vector<32x10xi32>
    %17 = arith.cmpi sge, %6, %16 : vector<32x10xi32>
    %c15_i32 = arith.constant 15 : i32
    %18 = vector.broadcast %c15_i32 : i32 to vector<32x10xi32>
    %19 = arith.cmpi slt, %6, %18 : vector<32x10xi32>
    %20 = arith.andi %17, %19 : vector<32x10xi1>
    %cst_8 = arith.constant 0.000000e+00 : f32
    %21 = vector.broadcast %cst_8 : f32 to vector<32x10xf32>
    %22 = arith.select %20, %15, %21 : vector<32x10xi1>, vector<32x10xf32>
    %23 = tpu.concatenate %14, %1, %22 in 1 : vector<32x10xf32>, vector<32x10xf32>, vector<32x10xf32> -> vector<32x30xf32>
    %24 = arith.truncf %23 : vector<32x30xf32> to vector<32x30xbf16>
    %cst_9 = arith.constant dense<0.000000e+00> : vector<32x64xf32>
    %25 = tpu.matmul %24, %2, %cst_9 {dimension_numbers = #tpu.dot_dimension_numbers<[1], [0], [0], [1], [0, 0, 1, 1], [], []>} : vector<32x30xbf16>, vector<30x64xbf16>, vector<32x64xf32> -> vector<32x64xf32>
    %cst_10 = arith.constant dense<0.000000e+00> : vector<64xf32>
    %26 = vector.multi_reduction <add>, %25, %cst_10 [0] : vector<32x64xf32> to vector<64xf32>
    %27 = vector.shape_cast %26 : vector<64xf32> to vector<1x64xf32>
    %cst_11 = arith.constant 3.200000e+01 : f32
    %28 = vector.broadcast %cst_11 : f32 to vector<1x64xf32>
    %29 = arith.divf %27, %28 : vector<1x64xf32>
    %30 = vector.broadcast %29 : vector<1x64xf32> to vector<32x64xf32>
    %31 = arith.subf %25, %30 : vector<32x64xf32>
    %32 = arith.mulf %31, %31 : vector<32x64xf32>
    %cst_12 = arith.constant dense<0.000000e+00> : vector<64xf32>
    %33 = vector.multi_reduction <add>, %32, %cst_12 [0] : vector<32x64xf32> to vector<64xf32>
    %34 = vector.shape_cast %33 : vector<64xf32> to vector<1x64xf32>
    %cst_13 = arith.constant 3.200000e+01 : f32
    %35 = vector.broadcast %cst_13 : f32 to vector<1x64xf32>
    %36 = arith.divf %34, %35 : vector<1x64xf32>
    %cst_14 = arith.constant 9.99999974E-6 : f32
    %37 = vector.broadcast %cst_14 : f32 to vector<1x64xf32>
    %38 = arith.addf %36, %37 : vector<1x64xf32>
    %39 = math.rsqrt %38 : vector<1x64xf32>
    %40 = vector.broadcast %39 : vector<1x64xf32> to vector<32x64xf32>
    %41 = arith.mulf %31, %40 : vector<32x64xf32>
    %42 = vector.broadcast %3 : vector<1x64xf32> to vector<32x64xf32>
    %43 = arith.mulf %41, %42 : vector<32x64xf32>
    %44 = vector.broadcast %4 : vector<1x64xf32> to vector<32x64xf32>
    %45 = arith.addf %43, %44 : vector<32x64xf32>
    %cst_15 = arith.constant 0.000000e+00 : f32
    %46 = vector.broadcast %cst_15 : f32 to vector<32x64xf32>
    %47 = arith.maximumf %45, %46 : vector<32x64xf32>
    %c0_16 = arith.constant 0 : index
    %c0_17 = arith.constant 0 : index
    %48 = vector.load %arg4[%c0_16, %c0_17] : memref<192x64xbf16, #tpu.memory_space<vmem>>, vector<192x64xbf16>
    %c0_18 = arith.constant 0 : index
    %c0_19 = arith.constant 0 : index
    %49 = vector.load %arg5[%c0_18, %c0_19] : memref<1x64xf32, #tpu.memory_space<vmem>>, vector<1x64xf32>
    %c0_20 = arith.constant 0 : index
    %c0_21 = arith.constant 0 : index
    %50 = vector.load %arg6[%c0_20, %c0_21] : memref<1x64xf32, #tpu.memory_space<vmem>>, vector<1x64xf32>
    %51 = tpu.iota {dimensions = array<i32: 1>} : vector<2x16x64xi32>
    %52 = vector.shape_cast %51 : vector<2x16x64xi32> to vector<32x64xi32>
    %c1_i32_22 = arith.constant 1 : i32
    %53 = tpu.dynamic_rotate %47 by %c1_i32_22 dim 0 : vector<32x64xf32>, i32 -> vector<32x64xf32>
    %c1_i32_23 = arith.constant 1 : i32
    %54 = vector.broadcast %c1_i32_23 : i32 to vector<32x64xi32>
    %55 = arith.cmpi sge, %52, %54 : vector<32x64xi32>
    %c17_i32_24 = arith.constant 17 : i32
    %56 = vector.broadcast %c17_i32_24 : i32 to vector<32x64xi32>
    %57 = arith.cmpi slt, %52, %56 : vector<32x64xi32>
    %58 = arith.andi %55, %57 : vector<32x64xi1>
    %cst_25 = arith.constant 0.000000e+00 : f32
    %59 = vector.broadcast %cst_25 : f32 to vector<32x64xf32>
    %60 = arith.select %58, %53, %59 : vector<32x64xi1>, vector<32x64xf32>
    %c31_i32_26 = arith.constant 31 : i32
    %61 = tpu.dynamic_rotate %47 by %c31_i32_26 dim 0 : vector<32x64xf32>, i32 -> vector<32x64xf32>
    %c-1_i32_27 = arith.constant -1 : i32
    %62 = vector.broadcast %c-1_i32_27 : i32 to vector<32x64xi32>
    %63 = arith.cmpi sge, %52, %62 : vector<32x64xi32>
    %c15_i32_28 = arith.constant 15 : i32
    %64 = vector.broadcast %c15_i32_28 : i32 to vector<32x64xi32>
    %65 = arith.cmpi slt, %52, %64 : vector<32x64xi32>
    %66 = arith.andi %63, %65 : vector<32x64xi1>
    %cst_29 = arith.constant 0.000000e+00 : f32
    %67 = vector.broadcast %cst_29 : f32 to vector<32x64xf32>
    %68 = arith.select %66, %61, %67 : vector<32x64xi1>, vector<32x64xf32>
    %69 = tpu.concatenate %60, %47, %68 in 1 : vector<32x64xf32>, vector<32x64xf32>, vector<32x64xf32> -> vector<32x192xf32>
    %70 = arith.truncf %69 : vector<32x192xf32> to vector<32x192xbf16>
    %cst_30 = arith.constant dense<0.000000e+00> : vector<32x64xf32>
    %71 = tpu.matmul %70, %48, %cst_30 {dimension_numbers = #tpu.dot_dimension_numbers<[1], [0], [0], [1], [0, 0, 1, 1], [], []>} : vector<32x192xbf16>, vector<192x64xbf16>, vector<32x64xf32> -> vector<32x64xf32>
    %cst_31 = arith.constant dense<0.000000e+00> : vector<64xf32>
    %72 = vector.multi_reduction <add>, %71, %cst_31 [0] : vector<32x64xf32> to vector<64xf32>
    %73 = vector.shape_cast %72 : vector<64xf32> to vector<1x64xf32>
    %cst_32 = arith.constant 3.200000e+01 : f32
    %74 = vector.broadcast %cst_32 : f32 to vector<1x64xf32>
    %75 = arith.divf %73, %74 : vector<1x64xf32>
    %76 = vector.broadcast %75 : vector<1x64xf32> to vector<32x64xf32>
    %77 = arith.subf %71, %76 : vector<32x64xf32>
    %78 = arith.mulf %77, %77 : vector<32x64xf32>
    %cst_33 = arith.constant dense<0.000000e+00> : vector<64xf32>
    %79 = vector.multi_reduction <add>, %78, %cst_33 [0] : vector<32x64xf32> to vector<64xf32>
    %80 = vector.shape_cast %79 : vector<64xf32> to vector<1x64xf32>
    %cst_34 = arith.constant 3.200000e+01 : f32
    %81 = vector.broadcast %cst_34 : f32 to vector<1x64xf32>
    %82 = arith.divf %80, %81 : vector<1x64xf32>
    %cst_35 = arith.constant 9.99999974E-6 : f32
    %83 = vector.broadcast %cst_35 : f32 to vector<1x64xf32>
    %84 = arith.addf %82, %83 : vector<1x64xf32>
    %85 = math.rsqrt %84 : vector<1x64xf32>
    %86 = vector.broadcast %85 : vector<1x64xf32> to vector<32x64xf32>
    %87 = arith.mulf %77, %86 : vector<32x64xf32>
    %88 = vector.broadcast %49 : vector<1x64xf32> to vector<32x64xf32>
    %89 = arith.mulf %87, %88 : vector<32x64xf32>
    %90 = vector.broadcast %50 : vector<1x64xf32> to vector<32x64xf32>
    %91 = arith.addf %89, %90 : vector<32x64xf32>
    %cst_36 = arith.constant 0.000000e+00 : f32
    %92 = vector.broadcast %cst_36 : f32 to vector<32x64xf32>
    %93 = arith.maximumf %91, %92 : vector<32x64xf32>
    %94 = arith.truncf %93 : vector<32x64xf32> to vector<32x64xbf16>
    %c0_37 = arith.constant 0 : index
    %c0_38 = arith.constant 0 : index
    %95 = vector.load %arg7[%c0_37, %c0_38] : memref<32x64xbf16, #tpu.memory_space<vmem>>, vector<32x64xbf16>
    tpu.vector_store %arg7[%c0_37, %c0_38], %94 {strides = array<i32>} : memref<32x64xbf16, #tpu.memory_space<vmem>>, vector<32x64xbf16>,
    return
  }
}

</mosaic_0001>

<bundles_post_ra>
// kernel: tpu_custom_call.1
= control target key start
LH: loop header
LB: loop body
LE: loop exit
PB: predicated region body
PF: predicated region fallthrough
CT: control target
= control target key end

     0   :  { %v42_v2 = vlaneseq  ;;  %vm145_vm0 = vcmask 1046528   ;;  %s911_s0 = inlined_call_operand.vmem [shape: bf16[32,10], index: 0, kind: input, shape index: {}]   ;;  %s912_s1 = inlined_call_operand.vmem [shape: bf16[30,64], index: 1, kind: input, shape index: {}]   ;;  %s913_s2 = inlined_call_operand.vmem [shape: f32[1,64], index: 2, kind: input, shape index: {}]   ;;  %s914_s3 = inlined_call_operand.vmem [shape: f32[1,64], index: 3, kind: input, shape index: {}]   ;;  %s915_s4 = inlined_call_operand.vmem [shape: bf16[192,64], index: 4, kind: input, shape index: {}]   ;;  %s916_s5 = inlined_call_operand.vmem [shape: f32[1,64], index: 5, kind: input, shape index: {}]   ;;  %s917_s6 = inlined_call_operand.vmem [shape: f32[1,64], index: 6, kind: input, shape index: {}]   ;;  %s918_s7 = inlined_call_operand.hbm [shape: bf16[32,64], index: 7, kind: output, shape index: {}]  }
   0x1   :  { %v601_v0 = vld [vmem:[%s911_s0] sm:$0xff]   ;;  %v608_v1 = vld [vmem:[%s911_s0 + $0x8] sm:$0xff]   ;;  %s700_s0 = smov 10  }
   0x2   :  { %v602_v3 = vunpack.c.l.bf16 %v601_v0  ;;  %v603_v4 = vunpack.c.h.bf16 %v601_v0  ;;  %v606_v5 = vunpack.c.l.bf16 %v608_v1  ;;  %v607_v6 = vunpack.c.h.bf16 %v608_v1  ;;  %v658_v7 = vld [vmem:[%s912_s1] sm:$0xff]   ;;  %v659_v13 = vld [vmem:[%s912_s1 + $0x8] sm:$0x7f]   ;;  %s701_s1 = smov 20  }
   0x3   :  { %v755_v8 = vshrl.u32 %v42_v2, 7  ;;  %613 = vmatprep.subr.bf16.mxu0 %v658_v7  ;;  %v147_v33 = vsel %vm145_vm0, %v659_v13, 0 }
   0x4   :  { %v46_v9 = vrot.slane %v603_v4, 7  ;;  %v628_v10 = vpack.i.bf16 %v603_v4, %v602_v3  ;;  %v45_v11 = vrot.slane %v602_v3, 7  ;;  %v64_v12 = vrot.slane %v602_v3, 1  ;;  %614 = vmatpush3.bf16.msra.mxu0 %v658_v7 }
   0x5   :  { %v761_v14 = vadd.s32 8, %v755_v8  ;;  %vm49_vm1 = vcmp.lt.s32.totalorder %v755_v8, 1  ;;  %v65_v15 = vrot.slane %v603_v4, 1  ;;  %v66_v16 = vrot.slane %v606_v5, 1  ;;  %621 = vmatprep.subr.msk.bf16.mxu0 %vm145_vm0, %v659_v13 }
   0x6   :  { %629 = vrot.lane.b32.xlu0 %v628_v10, %s700_s0  ;;  %vm68_vm2 = vcmp.lt.s32.totalorder %v755_v8, 7  ;;  %v633_v17 = vpack.i.bf16 %v607_v6, %v606_v5  ;;  %v67_v18 = vrot.slane %v607_v6, 1  ;;  %v47_v19 = vrot.slane %v606_v5, 7 }
   0x7   :  { %v70_v20 = vsel %vm68_vm2, %v65_v15, %v66_v16  ;;  %v71_v21 = vsel %vm68_vm2, %v64_v12, %v65_v15  ;;  %vm76_vm3 = vcmp.lt.s32.totalorder %v761_v14, 15  ;;  %v48_v22 = vrot.slane %v607_v6, 7 }
   0x8   :  { %v80_v23 = vsel %vm76_vm3, %v70_v20, 0.0  ;;  %v69_v24 = vsel %vm68_vm2, %v66_v16, %v67_v18  ;;  %v72_v25 = vsel %vm68_vm2, %v67_v18, %v64_v12  ;;  %v51_v26 = vsel %vm49_vm1, %v46_v9, %v47_v19  ;;  %616 = vmatpush3.bf16.msra.mxu0 %v147_v33 }
   0x9   :  { %v638_v27 = vpack.i.bf16 %v80_v23, %v71_v21  ;;  %v82_v28 = vsel %vm76_vm3, %v72_v25, 0.0  ;;  %v50_v29 = vsel %vm49_vm1, %v47_v19, %v48_v22  ;;  %v52_v30 = vsel %vm49_vm1, %v45_v11, %v46_v9 }
   0xa   :  { %634 = vrot.lane.b32.xlu0 %v633_v17, %s700_s0  ;;  %v53_v31 = vsel %vm49_vm1, %v48_v22, %v45_v11  ;;  %v643_v32 = vpack.i.bf16 %v82_v28, %v69_v24 }
   0xb   :  { %639 = vrot.lane.b32.xlu1 %v638_v27, %s701_s1 }
   0xf   :  { %644 = vrot.lane.b32.xlu1 %v643_v32, %s701_s1 }
  0x10   :  { %12 = vsyncpa [#allocation3], 0  ;;  %vm54_vm4 = vcmp.ge.s32.totalorder %v755_v8, 1  ;;  %vm115_vm5 = vcmask 80896   ;;  %vm120_vm6 = vcmask 162816   ;;  %vm138_vm7 = vcmask 244736  }
  0x11   :  { %v60_v37 = vsel %vm54_vm4, %v53_v31, 0.0  ;;  %v62_v46 = vsel %vm54_vm4, %v51_v26, 0.0  ;;  %v660_v58 = vld [vmem:[%s915_s4] sm:$0xff]   ;;  %v702_v59 = vmov 0   ;;  %v661_v60 = vld [vmem:[%s915_s4 + $0x8] sm:$0xff]   ;;  %v662_v61 = vld [vmem:[%s915_s4 + $0x10] sm:$0xff]  }
  0x12   :  { %418 = vmatprep.subr.bf16.mxu1 %v702_v59  ;;  %v663_v62 = vld [vmem:[%s915_s4 + $0x18] sm:$0xff]   ;;  %v664_v63 = vld [vmem:[%s915_s4 + $0x20] sm:$0xff]   ;;  %v665_v0 = vld [vmem:[%s915_s4 + $0x28] sm:$0xff]   ;;  %vm198_vm8 = vcmask 523264   ;;  %s704_s14 = smov [#allocation2]   ;;  %vm549_vm9 = vcmask 519168  }
  0x13   :  { %419 = vmatpush1.bf16.msra.mxu1 %v660_v58  ;;  %v666_v1 = vld [vmem:[%s915_s4 + $0x30] sm:$0xff]   ;;  %v667_v2 = vld [vmem:[%s915_s4 + $0x38] sm:$0xff]   ;;  %v668_v3 = vld [vmem:[%s915_s4 + $0x40] sm:$0xff]   ;;  %s559_s15 = sshll.u32 %s704_s14, 4  ;;  %s560_s15 = int_to_ptr.vmem [resolvable:$true] %s559_s15 }
  0x14   :  { %420 = vmatprep.subr.bf16.mxu1 %v702_v59  ;;  %v669_v4 = vld [vmem:[%s915_s4 + $0x48] sm:$0xff]   ;;  %v670_v5 = vld [vmem:[%s915_s4 + $0x50] sm:$0xff]   ;;  %p681_p1 = scmp.lt.s32.totalorder %s560_s15, %s560_s15 }
  0x17   :  { %421 = vmatpush1.bf16.msra.mxu1 %v661_v60 }
  0x18   :  { %422 = vmatprep.subr.bf16.mxu1 %v702_v59 }
  0x1b   :  { %423 = vmatpush1.bf16.msra.mxu1 %v662_v61 }
  0x1c   :  { %424 = vmatprep.subr.bf16.mxu1 %v702_v59 }
  0x1f   :  { %425 = vmatpush1.bf16.msra.mxu1 %v663_v62 }
  0x20   :  { %426 = vmatprep.subr.bf16.mxu1 %v702_v59 }
  0x23   :  { %427 = vmatpush1.bf16.msra.mxu1 %v664_v63 }
  0x24   :  { %428 = vmatprep.subr.bf16.mxu1 %v702_v59 }
  0x27   :  { %429 = vmatpush1.bf16.msra.mxu1 %v665_v0 }
  0x28   :  { %430 = vmatprep.subr.bf16.mxu1 %v702_v59 }
  0x2b   :  { %431 = vmatpush1.bf16.msra.mxu1 %v666_v1 }
  0x2c   :  { %432 = vmatprep.subr.bf16.mxu1 %v702_v59 }
  0x2f   :  { %433 = vmatpush1.bf16.msra.mxu1 %v667_v2 }
  0x30   :  { %434 = vmatprep.subr.bf16.mxu1 %v702_v59 }
  0x33   :  { %435 = vmatpush1.bf16.msra.mxu1 %v668_v3 }
  0x34   :  { %436 = vmatprep.subr.bf16.mxu1 %v702_v59 }
  0x37   :  { %437 = vmatpush1.bf16.msra.mxu1 %v669_v4 }
  0x38   :  { %438 = vmatprep.subr.bf16.mxu1 %v702_v59 }
  0x3b   :  { %439 = vmatpush1.bf16.msra.mxu1 %v670_v5 }
  0x3c   :  { %440 = vmatprep.subr.bf16.mxu1 %v702_v59 }
  0x78   :  { %v630_v34 = vpop.permute.xlu0 %629 }
  0x79   :  { %v632_v35 = vunpack.i.h.bf16 %v630_v34  ;;  %v631_v36 = vunpack.i.l.bf16 %v630_v34 }
  0x7b   :  { %v116_v42 = vsel %vm115_vm5, %v60_v37, %v631_v36  ;;  %v117_v43 = vsel %vm115_vm5, %v52_v30, %v632_v35 }
  0x7c   :  { %v635_v38 = vpop.permute.xlu0 %634 }
  0x7d   :  { %v640_v39 = vpop.permute.xlu1 %639  ;;  %v637_v40 = vunpack.i.h.bf16 %v635_v38  ;;  %v636_v41 = vunpack.i.l.bf16 %v635_v38 }
  0x7e   :  { %v642_v44 = vunpack.i.h.bf16 %v640_v39  ;;  %v641_v45 = vunpack.i.l.bf16 %v640_v39 }
  0x7f   :  { %v119_v49 = vsel %vm115_vm5, %v50_v29, %v637_v40  ;;  %v118_v50 = vsel %vm115_vm5, %v62_v46, %v636_v41 }
  0x80   :  { %v121_v47 = vsel %vm120_vm6, %v116_v42, %v641_v45  ;;  %v122_v48 = vsel %vm120_vm6, %v117_v43, %v642_v44 }
  0x81   :  { %v645_v51 = vpop.permute.xlu1 %644  ;;  %v125_v52 = vpack.c.bf16 %v122_v48, %v121_v47 }
  0x82   :  { %v647_v53 = vunpack.i.h.bf16 %v645_v51  ;;  %v646_v54 = vunpack.i.l.bf16 %v645_v51  ;;  %v574_v51 = vld [vmem:[%s913_s2] ss:$0 sm:$0xff]  ;;  %s703_s2 = smov 64  }
  0x83   :  { %617 = vmatprep.mubr.msk.bf16.mxu0 %vm138_vm7, %v125_v52 }
  0x84   :  { %v124_v55 = vsel %vm120_vm6, %v119_v49, %v647_v53  ;;  %v123_v56 = vsel %vm120_vm6, %v118_v50, %v646_v54  ;;  %v671_v49 = vld [vmem:[%s915_s4 + $0x58] sm:$0xff]  }
  0x85   :  { %v126_v57 = vpack.c.bf16 %v124_v55, %v123_v56  ;;  %441 = vmatpush1.bf16.msra.mxu1 %v671_v49  ;;  %v575_v56 = vld [vmem:[%s914_s3] ss:$0 sm:$0xff] }
  0x87   :  { %618 = vmatmul.mubr.msk.bf16.vlgmr.msra.gmra.mrb[0].mxu0 %vm138_vm7, %v126_v57 }
 0x15a   :  { %v619_v6 = vpop.f32.mrb[0].mxu0 }
 0x15b   :  { %v183_v7 = vpop.f32.mrb[1].mxu0  ;;  %v202_v15 = vsel %vm198_vm8, %v619_v6, 0.0 }
 0x15c   :  { %v620_v9 = vpop.f32.mrb[2].mxu0  ;;  %v199_v11 = vsel %vm198_vm8, %v183_v7, 0.0 }
 0x15d   :  { %v186_v10 = vpop.f32.mrb[3].mxu0  ;;  %v204_v17 = vsel %vm198_vm8, %v620_v9, 0.0 }
 0x15e   :  { %v200_v12 = vsel %vm198_vm8, %v186_v10, 0.0 }
 0x15f   :  { %v201_v13 = vadd.f32 %v200_v12, %v199_v11 }
 0x161   :  { %v203_v16 = vadd.f32 %v202_v15, %v201_v13 }
 0x163   :  { %v205_v18 = vadd.f32 %v204_v17, %v203_v16 }
 0x165   :  { %v206_v19 = vrot.slane %v205_v18, 4 }
 0x167   :  { %v207_v20 = vadd.f32 %v206_v19, %v205_v18 }
 0x169   :  { %v208_v21 = vrot.slane %v207_v20, 2 }
 0x16b   :  { %v209_v22 = vadd.f32 %v208_v21, %v207_v20 }
 0x16d   :  { %v210_v23 = vrot.slane %v209_v22, 1 }
 0x16f   :  { %v211_v24 = vadd.f32 %v210_v23, %v209_v22 }
 0x171   :  { %v213_v25 = vmul.f32 0.03125, %v211_v24 }
 0x173   :  { %v214_v26 = vsub.f32 %v183_v7, %v213_v25  ;;  %v215_v27 = vsub.f32 %v186_v10, %v213_v25  ;;  %v216_v28 = vsub.f32 %v619_v6, %v213_v25  ;;  %v217_v29 = vsub.f32 %v620_v9, %v213_v25 }
 0x175   :  { %v218_v30 = vmul.f32 %v214_v26, %v214_v26  ;;  %v219_v31 = vmul.f32 %v215_v27, %v215_v27  ;;  %v220_v32 = vmul.f32 %v216_v28, %v216_v28  ;;  %v221_v33 = vmul.f32 %v217_v29, %v217_v29 }
 0x177   :  { %v222_v34 = vsel %vm198_vm8, %v218_v30, 0.0  ;;  %v223_v35 = vsel %vm198_vm8, %v219_v31, 0.0  ;;  %v225_v37 = vsel %vm198_vm8, %v220_v32, 0.0  ;;  %v227_v39 = vsel %vm198_vm8, %v221_v33, 0.0 }
 0x178   :  { %v224_v36 = vadd.f32 %v223_v35, %v222_v34 }
 0x17a   :  { %v226_v38 = vadd.f32 %v225_v37, %v224_v36 }
 0x17c   :  { %v228_v40 = vadd.f32 %v227_v39, %v226_v38 }
 0x17e   :  { %v229_v41 = vrot.slane %v228_v40, 4 }
 0x180   :  { %v230_v42 = vadd.f32 %v229_v41, %v228_v40 }
 0x182   :  { %v231_v43 = vrot.slane %v230_v42, 2 }
 0x184   :  { %v232_v44 = vadd.f32 %v231_v43, %v230_v42 }
 0x186   :  { %v233_v45 = vrot.slane %v232_v44, 1 }
 0x188   :  { %v234_v46 = vadd.f32 %v233_v45, %v232_v44 }
 0x18a   :  { %v235_v47 = vmul.f32 0.03125, %v234_v46 }
 0x18c   :  { %v236_v48 = vadd.f32 1e-05, %v235_v47 }
 0x18e   :  { %672 = vrsqrt.f32 %v236_v48 }
 0x198   :  { %v673_v50 = vpop.eup %672 }
 0x199   :  { %v238_v52 = vmul.f32 %v673_v50, %v214_v26  ;;  %v239_v53 = vmul.f32 %v673_v50, %v215_v27  ;;  %v240_v54 = vmul.f32 %v673_v50, %v216_v28  ;;  %v241_v55 = vmul.f32 %v673_v50, %v217_v29 }
 0x19b   :  { %v249_v57 = vmul.f32 %v574_v51, %v239_v53  ;;  %v250_v58 = vmul.f32 %v574_v51, %v240_v54  ;;  %v251_v59 = vmul.f32 %v574_v51, %v241_v55  ;;  %v248_v60 = vmul.f32 %v574_v51, %v238_v52 }
 0x19d   :  { %v259_v61 = vadd.f32 %v575_v56, %v249_v57  ;;  %v260_v62 = vadd.f32 %v575_v56, %v250_v58  ;;  %v261_v63 = vadd.f32 %v575_v56, %v251_v59  ;;  %v258_v0 = vadd.f32 %v575_v56, %v248_v60 }
 0x19f   :  { %v263_v1 = vmax.f32 %v259_v61, 0.0  ;;  %v264_v2 = vmax.f32 %v260_v62, 0.0  ;;  %v265_v3 = vmax.f32 %v261_v63, 0.0  ;;  %v262_v4 = vmax.f32 %v258_v0, 0.0 }
 0x1a1   :  { %v293_v5 = vrot.slane %v263_v1, 7  ;;  %v653_v6 = vpack.i.bf16 %v265_v3, %v264_v2  ;;  %v648_v7 = vpack.i.bf16 %v263_v1, %v262_v4  ;;  %v304_v9 = vrot.slane %v262_v4, 1 }
 0x1a2   :  { %v305_v10 = vrot.slane %v263_v1, 1  ;;  %v306_v11 = vrot.slane %v264_v2, 1  ;;  %v292_v12 = vrot.slane %v262_v4, 7  ;;  %v295_v13 = vrot.slane %v265_v3, 7 }
 0x1a3   :  { %654 = vrot.lane.b32.xlu1 %v653_v6, %s703_s2  ;;  %649 = vrot.lane.b32.xlu0 %v648_v7, %s703_s2  ;;  %v307_v15 = vrot.slane %v265_v3, 1  ;;  %v294_v16 = vrot.slane %v264_v2, 7 }
 0x1a4   :  { %v309_v17 = vsel %vm68_vm2, %v305_v10, %v306_v11  ;;  %v310_v18 = vsel %vm68_vm2, %v304_v9, %v305_v10  ;;  %v298_v19 = vsel %vm49_vm1, %v292_v12, %v293_v5  ;;  %v299_v20 = vsel %vm49_vm1, %v295_v13, %v292_v12 }
 0x1a5   :  { %v313_v21 = vsel %vm76_vm3, %v309_v17, 0.0  ;;  %v308_v22 = vsel %vm68_vm2, %v306_v11, %v307_v15  ;;  %v311_v23 = vsel %vm68_vm2, %v307_v15, %v304_v9  ;;  %v296_v26 = vsel %vm49_vm1, %v294_v16, %v295_v13 }
 0x1a6   :  { %v337_v24 = vpack.c.bf16 %v313_v21, %v310_v18  ;;  %v315_v25 = vsel %vm76_vm3, %v311_v23, 0.0  ;;  %v297_v27 = vsel %vm49_vm1, %v293_v5, %v294_v16  ;;  %v300_v35 = vsel %vm54_vm4, %v299_v20, 0.0 }
 0x1a7   :  { %v339_v28 = vpack.c.bf16 %v315_v25, %v308_v22  ;;  %v302_v14 = vsel %vm54_vm4, %v297_v27, 0.0  ;;  %v590_v25 = vld [vmem:[%s916_s5] ss:$0 sm:$0xff]  ;;  %s676_s5 = scalar_lea.vmem %s560_s15, 256 }
 0x1a8   :  { %588 = vmatprep.mubr.msk.bf16.mxu1 %vm198_vm8, %v337_v24  ;;  %p677_p0 = scmp.ne.s32.totalorder %s560_s15, %s676_s5  ;;  %p682_p2 = scmp.lt.s32.totalorder %s676_s5, %s676_s5 }
 0x1aa   :  { %p683_p3 = por %p682_p2, %p681_p1 }
 0x1ac   :  { %p684_p4 = pnand %p683_p3, %p677_p0 }
 0x215   :  { %v655_v29 = vpop.permute.xlu1 %654  ;;  %v650_v30 = vpop.permute.xlu0 %649 }
 0x216   :  { %v657_v31 = vunpack.i.h.bf16 %v655_v29  ;;  %v656_v32 = vunpack.i.l.bf16 %v655_v29  ;;  %v652_v33 = vunpack.i.h.bf16 %v650_v30  ;;  %v651_v34 = vunpack.i.l.bf16 %v650_v30  ;;  %v591_v30 = vld [vmem:[%s917_s6] ss:$0 sm:$0xff] }
 0x218   :  { %v332_v36 = vsel %vm198_vm8, %v300_v35, %v651_v34  ;;  %v333_v37 = vsel %vm198_vm8, %v298_v19, %v652_v33  ;;  %v334_v38 = vsel %vm198_vm8, %v302_v14, %v656_v32  ;;  %v335_v39 = vsel %vm198_vm8, %v296_v26, %v657_v31 }
 0x219   :  { %v336_v40 = vpack.c.bf16 %v333_v37, %v332_v36  ;;  %v338_v41 = vpack.c.bf16 %v335_v39, %v334_v38 }
 0x21b   :  { %451 = vmatmul.mubr.bf16.vlgmr.msra.gmra.mrb[0].mxu1 %v336_v40 }
 0x21c   :  { %589 = vmatprep.mubr.msk.bf16.mxu1 %vm198_vm8, %v339_v28 }
 0x223   :  { %459 = vmatmul.mubr.bf16.gmra.mrb[4].mxu1 %v338_v41 }
 0x2ee   :  { %v452_v42 = vpop.f32.mrb[0].mxu1 }
 0x2ef   :  { %v454_v43 = vpop.f32.mrb[1].mxu1  ;;  %v467_v8 = vsel %vm198_vm8, %v452_v42, 0.0 }
 0x2f0   :  { %v455_v44 = vpop.f32.mrb[2].mxu1 }
 0x2f1   :  { %v468_v45 = vsel %vm198_vm8, %v455_v44, 0.0  ;;  %v457_v46 = vpop.f32.mrb[3].mxu1 }
 0x2f2   :  { %v469_v47 = vadd.f32 %v468_v45, %v467_v8 }
 0x2f6   :  { %v460_v48 = vpop.f32.mrb[4].mxu1 }
 0x2f7   :  { %v470_v49 = vsel %vm198_vm8, %v460_v48, 0.0  ;;  %v462_v50 = vpop.f32.mrb[5].mxu1 }
 0x2f8   :  { %v471_v51 = vadd.f32 %v470_v49, %v469_v47  ;;  %v463_v52 = vpop.f32.mrb[6].mxu1 }
 0x2f9   :  { %v472_v53 = vsel %vm198_vm8, %v463_v52, 0.0  ;;  %v465_v54 = vpop.f32.mrb[7].mxu1 }
 0x2fa   :  { %v473_v55 = vadd.f32 %v472_v53, %v471_v51 }
 0x2fc   :  { %v474_v56 = vrot.slane %v473_v55, 4 }
 0x2fe   :  { %v475_v57 = vadd.f32 %v474_v56, %v473_v55 }
 0x300   :  { %v476_v58 = vrot.slane %v475_v57, 2 }
 0x302   :  { %v477_v59 = vadd.f32 %v476_v58, %v475_v57 }
 0x304   :  { %v478_v60 = vrot.slane %v477_v59, 1 }
 0x306   :  { %v479_v61 = vadd.f32 %v478_v60, %v477_v59 }
 0x308   :  { %v480_v62 = vmul.f32 0.03125, %v479_v61 }
 0x30a   :  { %v481_v63 = vsub.f32 %v452_v42, %v480_v62  ;;  %v482_v0 = vsub.f32 %v455_v44, %v480_v62  ;;  %v483_v1 = vsub.f32 %v460_v48, %v480_v62  ;;  %v484_v2 = vsub.f32 %v463_v52, %v480_v62 }
 0x30c   :  { %v485_v3 = vmul.f32 %v481_v63, %v481_v63  ;;  %v486_v4 = vmul.f32 %v482_v0, %v482_v0  ;;  %v487_v5 = vmul.f32 %v483_v1, %v483_v1  ;;  %v488_v6 = vmul.f32 %v484_v2, %v484_v2 }
 0x30e   :  { %v489_v7 = vsel %vm198_vm8, %v485_v3, 0.0  ;;  %v490_v9 = vsel %vm198_vm8, %v486_v4, 0.0  ;;  %v492_v11 = vsel %vm198_vm8, %v487_v5, 0.0  ;;  %v494_v13 = vsel %vm198_vm8, %v488_v6, 0.0 }
 0x30f   :  { %v491_v10 = vadd.f32 %v490_v9, %v489_v7 }
 0x311   :  { %v493_v12 = vadd.f32 %v492_v11, %v491_v10 }
 0x313   :  { %v495_v15 = vadd.f32 %v494_v13, %v493_v12 }
 0x315   :  { %v496_v16 = vrot.slane %v495_v15, 4 }
 0x317   :  { %v497_v17 = vadd.f32 %v496_v16, %v495_v15 }
 0x319   :  { %v498_v18 = vrot.slane %v497_v17, 2 }
 0x31b   :  { %v499_v19 = vadd.f32 %v498_v18, %v497_v17 }
 0x31d   :  { %v500_v20 = vrot.slane %v499_v19, 1 }
 0x31f   :  { %v501_v21 = vadd.f32 %v500_v20, %v499_v19 }
 0x321   :  { %v502_v22 = vmul.f32 0.03125, %v501_v21 }
 0x323   :  { %v503_v23 = vadd.f32 1e-05, %v502_v22 }
 0x325   :  { %674 = vrsqrt.f32 %v503_v23 }
 0x32f   :  { %v675_v24 = vpop.eup %674 }
 0x330   :  { %v505_v26 = vmul.f32 %v675_v24, %v481_v63  ;;  %v506_v27 = vmul.f32 %v675_v24, %v482_v0  ;;  %v507_v28 = vmul.f32 %v675_v24, %v483_v1  ;;  %v508_v29 = vmul.f32 %v675_v24, %v484_v2 }
 0x332   :  { %v515_v31 = vmul.f32 %v590_v25, %v505_v26  ;;  %v516_v32 = vmul.f32 %v590_v25, %v506_v27  ;;  %v517_v33 = vmul.f32 %v590_v25, %v507_v28  ;;  %v518_v34 = vmul.f32 %v590_v25, %v508_v29 }
 0x334   :  { %v525_v35 = vadd.f32 %v591_v30, %v515_v31  ;;  %v526_v14 = vadd.f32 %v591_v30, %v516_v32  ;;  %v527_v36 = vadd.f32 %v591_v30, %v517_v33  ;;  %v528_v37 = vadd.f32 %v591_v30, %v518_v34 }
 0x336   :  { %v529_v38 = vmax.f32 %v525_v35, 0.0  ;;  %v530_v39 = vmax.f32 %v526_v14, 0.0  ;;  %v531_v40 = vmax.f32 %v527_v36, 0.0  ;;  %v532_v41 = vmax.f32 %v528_v37, 0.0 }
 0x338   :  { %v596_v42 = vpack.c.bf16 %v529_v38, %v529_v38  ;;  %v597_v43 = vpack.c.bf16 %v530_v39, %v530_v39  ;;  %v598_v44 = vpack.c.bf16 %v531_v40, %v531_v40  ;;  %v599_v8 = vpack.c.bf16 %v532_v41, %v532_v41 }
 0x33a   :  { %553 = vst.msk [vmem:[#allocation2 + $0xc] sm:$0xf] %vm549_vm9, %v599_v8  ;;  %550 = vst.msk [vmem:[#allocation2] sm:$0xf] %vm549_vm9, %v596_v42 }
 0x33b   :  { %551 = vst.msk [vmem:[#allocation2 + $0x4] sm:$0xf] %vm549_vm9, %v597_v43  ;;  %552 = vst.msk [vmem:[#allocation2 + $0x8] sm:$0xf] %vm549_vm9, %v598_v44 }
 0x33c   :  { %687 = shalt.err (!%p684_p4)
}
 0x33d   :  { %s688_s17 = scalar_lea.hbm %s918_s7, 256 }
 0x33e   :  { %p689_p5 = scmp.ne.s32.totalorder %s918_s7, %s688_s17  ;;  %p692_p6 = scmp.lt.u32.totalorder %s688_s17, %s918_s7 }
 0x340   :  { %p694_p7 = pnand %p692_p6, %p689_p5 }
 0x342   :  { %697 = shalt.err (!%p694_p7)
}
 0x343   :  { %s705_s22 = smov 4  }
 0x344   :  { %565 = dma.vmem_to_hbm [thread:$0]  %s560_s15, 256, %s918_s7, [#allocation3], %s703_s2, %s703_s2, %s705_s22  }
 0x345   :  { %698 = dma.done.wait [#allocation3], 256  }
 0x346   :  { %699 = vsyncadd [#allocation3], 4294967040 }
 0x347   :  { %569 = vsyncpa [#allocation3], 1 }

</bundles_post_ra>
